<compile_context>
chip_gen: v5e
topology: v5e:2x2
jax: 0.10.0
libtpu: 0.0.40
codegen_flags: <defaults>
</compile_context>

<pallas_src>
import functools

import jax
import jax.numpy as jnp
from jax.experimental import pallas as pl
from jax.experimental.pallas import tpu as pltpu


def _round_up(x, m):
    return (x + m - 1) // m * m


def _mlp_logsoftmax_kernel(x_ref, w1_ref, b1_ref, w2_ref, b2_ref, o_ref):
    # x_ref: (TM, E) tile of flattened token embeddings (compute dtype).
    x = x_ref[...]

    # fc: Linear(E -> H) + ReLU   (Dropout is identity in eval mode)
    h = jnp.dot(x, w1_ref[...], preferred_element_type=jnp.float32)
    h = jnp.maximum(h + b1_ref[...], 0.0)            # bias + ReLU in f32
    # TODO(synk): training-mode dropout (pltpu.prng_*) omitted; eval semantics only.

    # linear_output_to_tag: Linear(H -> T_pad); second matmul in compute dtype.
    logits = jnp.dot(h.astype(w2_ref.dtype), w2_ref[...],
                     preferred_element_type=jnp.float32)
    logits = logits + b2_ref[...]                    # padded lanes get -1e30

    # log_softmax over the (padded) tag dimension; padded lanes contribute 0
    # to the sum and never win the max.
    m = jnp.max(logits, axis=-1, keepdims=True)
    shifted = logits - m
    p = jnp.exp(shifted)
    lse = jnp.log(jnp.sum(p, axis=-1, keepdims=True))
    o_ref[...] = (shifted - lse).astype(o_ref.dtype)


@functools.partial(jax.jit, static_argnames=("tile_m", "compute_dtype"))
def wv_bert_mlp_head(embedded, w1, b1, w2, b2, *, tile_m=None,
                     compute_dtype=jnp.bfloat16):
    """embedded: (B, S, E) float32. Weights stored (in, out). Returns
    (B*S, tags_size) float32 log-probs."""
    B, S, E = embedded.shape
    H = w1.shape[1]
    T = w2.shape[1]
    M = B * S

    # --- tiling: cap the row tile, keep it a multiple of 8 (sublane rule) ---
    if tile_m is None:
        tile_m = min(512, _round_up(M, 8))
    assert tile_m % 8 == 0, "tile_m must be a multiple of 8 (sublane rule)"

    M_pad = _round_up(M, tile_m)
    T_pad = _round_up(T, 128)        # lane-dense output / second-matmul N dim

    # --- prepare operands (pad + cast outside the kernel) ---
    x = embedded.reshape(M, E)
    if M_pad != M:
        x = jnp.pad(x, ((0, M_pad - M), (0, 0)))     # zero rows, sliced off later
    x = x.astype(compute_dtype)

    w1c = w1.astype(compute_dtype)

    w2c = w2
    b2p = b2
    if T_pad != T:
        w2c = jnp.pad(w2c, ((0, 0), (0, T_pad - T)))                    # zero cols
        b2p = jnp.pad(b2p, (0, T_pad - T), constant_values=-1e30)       # never wins
    w2c = w2c.astype(compute_dtype)

    b1_2d = b1.reshape(1, H).astype(jnp.float32)
    b2_2d = b2p.reshape(1, T_pad).astype(jnp.float32)

    grid = (M_pad // tile_m,)

    # --- VMEM budget: double-buffered x/out tiles + resident weights/biases ---
    in_item = jnp.dtype(compute_dtype).itemsize
    vmem_need = (2 * tile_m * E * in_item          # x tile, double-buffered
                 + 2 * tile_m * T_pad * 4          # out tile (f32), double-buffered
                 + E * H * in_item                 # w1 (resident)
                 + H * T_pad * in_item             # w2 (resident)
                 + (H + T_pad) * 4)                # biases
    vmem_limit = int(min(64 * 1024 * 1024,
                         max(32 * 1024 * 1024, 2 * vmem_need)))

    out = pl.pallas_call(
        _mlp_logsoftmax_kernel,
        out_shape=jax.ShapeDtypeStruct((M_pad, T_pad), jnp.float32),
        grid_spec=pltpu.PrefetchScalarGridSpec(
            num_scalar_prefetch=0,
            grid=grid,
            in_specs=[
                pl.BlockSpec((tile_m, E), lambda i: (i, 0)),    # x tile (streamed)
                pl.BlockSpec((E, H), lambda i: (0, 0)),         # w1 (resident)
                pl.BlockSpec((1, H), lambda i: (0, 0)),         # b1
                pl.BlockSpec((H, T_pad), lambda i: (0, 0)),     # w2 (resident)
                pl.BlockSpec((1, T_pad), lambda i: (0, 0)),     # b2
            ],
            out_specs=pl.BlockSpec((tile_m, T_pad), lambda i: (i, 0)),
        ),
        compiler_params=pltpu.CompilerParams(
            dimension_semantics=("parallel",),
            vmem_limit_bytes=vmem_limit,
        ),
    )(x, w1c, b1_2d, w2c, b2_2d)

    # drop row padding and tag-lane padding
    return out[:M, :T]


def reference(embedded, w1, b1, w2, b2):
    B, S, E = embedded.shape
    x = embedded.reshape(B * S, E)
    h = jnp.maximum(x @ w1 + b1, 0.0)
    logits = h @ w2 + b2
    return jax.nn.log_softmax(logits, axis=1)


if __name__ == "__main__":
    # Small shapes implied by the forward pass:
    #   batch=2, seq_len=8 (after special-token removal),
    #   embedding_dim=32, hidden_dim=32, tags_size=16
    B, S, E, H, T = 2, 8, 32, 32, 16

    key = jax.random.PRNGKey(0)
    k_emb, k_w1, k_b1, k_w2, k_b2 = jax.random.split(key, 5)

    embedded = jax.random.normal(k_emb, (B, S, E), dtype=jnp.float32)
    # Deterministic synthetic parameters (module __init__ defines the shapes).
    w1 = jax.random.normal(k_w1, (E, H), dtype=jnp.float32) * (1.0 / jnp.sqrt(E))
    b1 = jax.random.normal(k_b1, (H,), dtype=jnp.float32) * 0.01
    w2 = jax.random.normal(k_w2, (H, T), dtype=jnp.float32) * (1.0 / jnp.sqrt(H))
    b2 = jax.random.normal(k_b2, (T,), dtype=jnp.float32) * 0.01

    ref = reference(embedded, w1, b1, w2, b2)

    # f32 compute path: tight match vs reference.
    tag_scores_f32 = wv_bert_mlp_head(embedded, w1, b1, w2, b2,
                                      compute_dtype=jnp.float32)
    tag_scores_f32 = jax.block_until_ready(tag_scores_f32)
    assert tag_scores_f32.shape == (B * S, T)
    assert jnp.allclose(tag_scores_f32, ref, atol=1e-5, rtol=1e-5), \
        "f32 kernel mismatch vs reference"

    # default bf16-matmul / f32-accumulate path: loose tolerance (MXU-native rate).
    tag_scores_bf16 = wv_bert_mlp_head(embedded, w1, b1, w2, b2)
    tag_scores_bf16 = jax.block_until_ready(tag_scores_bf16)
    assert tag_scores_bf16.shape == (B * S, T)
    assert jnp.allclose(tag_scores_bf16, ref, atol=1e-1, rtol=1e-2), \
        "bf16 kernel mismatch vs reference"

    print("KERNEL_OK")
</pallas_src>

<mosaic_0001>
module attributes {stable_mosaic.version = 11 : i64} {
  func.func @_mlp_logsoftmax_kernel(%arg0: i32, %arg1: memref<16x32xf32, #tpu.memory_space<vmem>>, %arg2: memref<32x32xf32, #tpu.memory_space<vmem>>, %arg3: memref<1x32xf32, #tpu.memory_space<vmem>>, %arg4: memref<32x128xf32, #tpu.memory_space<vmem>>, %arg5: memref<1x128xf32, #tpu.memory_space<vmem>>, %arg6: memref<16x128xf32, #tpu.memory_space<vmem>>) attributes {dimension_semantics = [#tpu.dimension_semantics<parallel>], iteration_bounds = array<i64: 1>, scalar_prefetch = 0 : i64, scratch_operands = 0 : i64, tpu.core_type = #tpu.core_type<tc>, window_params = [{transform_indices = @transform_0, window_bounds = array<i64: 16, 32>}, {pipeline_mode = #tpu.pipeline_mode<synchronous>, transform_indices = @transform_1, window_bounds = array<i64: 32, 32>}, {pipeline_mode = #tpu.pipeline_mode<synchronous>, transform_indices = @transform_2, window_bounds = array<i64: 1, 32>}, {pipeline_mode = #tpu.pipeline_mode<synchronous>, transform_indices = @transform_3, window_bounds = array<i64: 32, 128>}, {pipeline_mode = #tpu.pipeline_mode<synchronous>, transform_indices = @transform_4, window_bounds = array<i64: 1, 128>}, {transform_indices = @transform_5, window_bounds = array<i64: 16, 128>}]} {
    %c0 = arith.constant 0 : index
    %c0_0 = arith.constant 0 : index
    %0 = vector.load %arg1[%c0, %c0_0] : memref<16x32xf32, #tpu.memory_space<vmem>>, vector<16x32xf32>
    %c0_1 = arith.constant 0 : index
    %c0_2 = arith.constant 0 : index
    %1 = vector.load %arg2[%c0_1, %c0_2] : memref<32x32xf32, #tpu.memory_space<vmem>>, vector<32x32xf32>
    %cst = arith.constant dense<0.000000e+00> : vector<16x32xf32>
    %2 = tpu.matmul %0, %1, %cst {dimension_numbers = #tpu.dot_dimension_numbers<[1], [0], [0], [1], [0, 0, 1, 1], [], []>} : vector<16x32xf32>, vector<32x32xf32>, vector<16x32xf32> -> vector<16x32xf32>
    %c0_3 = arith.constant 0 : index
    %c0_4 = arith.constant 0 : index
    %3 = vector.load %arg3[%c0_3, %c0_4] : memref<1x32xf32, #tpu.memory_space<vmem>>, vector<1x32xf32>
    %4 = vector.broadcast %3 : vector<1x32xf32> to vector<16x32xf32>
    %5 = arith.addf %2, %4 : vector<16x32xf32>
    %cst_5 = arith.constant 0.000000e+00 : f32
    %6 = vector.broadcast %cst_5 : f32 to vector<16x32xf32>
    %7 = arith.maximumf %5, %6 : vector<16x32xf32>
    %c0_6 = arith.constant 0 : index
    %c0_7 = arith.constant 0 : index
    %8 = vector.load %arg4[%c0_6, %c0_7] : memref<32x128xf32, #tpu.memory_space<vmem>>, vector<32x128xf32>
    %cst_8 = arith.constant dense<0.000000e+00> : vector<16x128xf32>
    %9 = tpu.matmul %7, %8, %cst_8 {dimension_numbers = #tpu.dot_dimension_numbers<[1], [0], [0], [1], [0, 0, 1, 1], [], []>} : vector<16x32xf32>, vector<32x128xf32>, vector<16x128xf32> -> vector<16x128xf32>
    %c0_9 = arith.constant 0 : index
    %c0_10 = arith.constant 0 : index
    %10 = vector.load %arg5[%c0_9, %c0_10] : memref<1x128xf32, #tpu.memory_space<vmem>>, vector<1x128xf32>
    %11 = vector.broadcast %10 : vector<1x128xf32> to vector<16x128xf32>
    %12 = arith.addf %9, %11 : vector<16x128xf32>
    %cst_11 = arith.constant dense<0xFF800000> : vector<16xf32>
    %13 = vector.multi_reduction <maximumf>, %12, %cst_11 [1] : vector<16x128xf32> to vector<16xf32>
    %14 = vector.shape_cast %13 : vector<16xf32> to vector<16x1xf32>
    %15 = vector.broadcast %14 : vector<16x1xf32> to vector<16x128xf32>
    %16 = arith.subf %12, %15 : vector<16x128xf32>
    %17 = math.exp %16 : vector<16x128xf32>
    %cst_12 = arith.constant dense<0.000000e+00> : vector<16xf32>
    %18 = vector.multi_reduction <add>, %17, %cst_12 [1] : vector<16x128xf32> to vector<16xf32>
    %19 = vector.shape_cast %18 : vector<16xf32> to vector<16x1xf32>
    %20 = math.log %19 : vector<16x1xf32>
    %21 = vector.broadcast %20 : vector<16x1xf32> to vector<16x128xf32>
    %22 = arith.subf %16, %21 : vector<16x128xf32>
    %c0_13 = arith.constant 0 : index
    %c0_14 = arith.constant 0 : index
    %23 = vector.load %arg6[%c0_13, %c0_14] : memref<16x128xf32, #tpu.memory_space<vmem>>, vector<16x128xf32>
    tpu.vector_store %arg6[%c0_13, %c0_14], %22 {strides = array<i32>} : memref<16x128xf32, #tpu.memory_space<vmem>>, vector<16x128xf32>,
    return
  }
  func.func @transform_0(%arg0: i32) -> (i32, i32) {
    %c0_i32 = arith.constant 0 : i32
    %c0_i32_0 = arith.constant 0 : i32
    return %arg0, %c0_i32 : i32, i32
  }
  func.func @transform_1(%arg0: i32) -> (i32, i32) {
    %c0_i32 = arith.constant 0 : i32
    %c0_i32_0 = arith.constant 0 : i32
    %c0_i32_1 = arith.constant 0 : i32
    return %c0_i32, %c0_i32_0 : i32, i32
  }
  func.func @transform_2(%arg0: i32) -> (i32, i32) {
    %c0_i32 = arith.constant 0 : i32
    %c0_i32_0 = arith.constant 0 : i32
    %c0_i32_1 = arith.constant 0 : i32
    return %c0_i32, %c0_i32_0 : i32, i32
  }
  func.func @transform_3(%arg0: i32) -> (i32, i32) {
    %c0_i32 = arith.constant 0 : i32
    %c0_i32_0 = arith.constant 0 : i32
    %c0_i32_1 = arith.constant 0 : i32
    return %c0_i32, %c0_i32_0 : i32, i32
  }
  func.func @transform_4(%arg0: i32) -> (i32, i32) {
    %c0_i32 = arith.constant 0 : i32
    %c0_i32_0 = arith.constant 0 : i32
    %c0_i32_1 = arith.constant 0 : i32
    return %c0_i32, %c0_i32_0 : i32, i32
  }
  func.func @transform_5(%arg0: i32) -> (i32, i32) {
    %c0_i32 = arith.constant 0 : i32
    %c0_i32_0 = arith.constant 0 : i32
    return %arg0, %c0_i32 : i32, i32
  }
}

</mosaic_0001>

<bundles_post_ra>
// kernel: wv_bert_mlp_head.1
= control target key start
LH: loop header
LB: loop body
LE: loop exit
PB: predicated region body
PF: predicated region fallthrough
CT: control target
= control target key end

     0   :  { %s267_s0 = inlined_call_operand.vmem [shape: f32[16,32], index: 0, kind: input, shape index: {}]   ;;  %s268_s1 = inlined_call_operand.vmem [shape: f32[32,32], index: 1, kind: input, shape index: {}]   ;;  %s269_s2 = inlined_call_operand.vmem [shape: f32[1,32], index: 2, kind: input, shape index: {}]   ;;  %s270_s3 = inlined_call_operand.vmem [shape: f32[32,128], index: 3, kind: input, shape index: {}]   ;;  %s271_s4 = inlined_call_operand.vmem [shape: f32[1,128], index: 4, kind: input, shape index: {}]   ;;  %s272_s5 = inlined_call_operand.hbm [shape: f32[16,128], index: 5, kind: output, shape index: {}]  }
   0x1   :  { %v26_v0 = vld [vmem:[%s268_s1 + $0x18] sm:$0xff]  ;;  %v25_v1 = vld [vmem:[%s268_s1 + $0x10] sm:$0xff]  ;;  %v24_v2 = vld [vmem:[%s268_s1 + $0x8] sm:$0xff] }
   0x2   :  { %50 = vmatpush.msra.mxu0 %v26_v0  ;;  %144 = vmatpush.msra.mxu2 %v26_v0  ;;  %v66_v3 = vld [vmem:[%s270_s3 + $0x18] sm:$0xff] }
   0x4   :  { %51 = vmatpush.msra.mxu0 %v25_v1  ;;  %145 = vmatpush.msra.mxu2 %v25_v1 }
   0x5   :  { %10 = vsyncpa [#allocation3], 0  ;;  %v23_v4 = vld [vmem:[%s268_s1] sm:$0xff]  ;;  %89 = vmatpush.msra.mxu1 %v66_v3  ;;  %148 = vmatpush.msra.mxu3 %v66_v3  ;;  %vm31_vm0 = vcmask 261120   ;;  %v22_v6 = vld [vmem:[%s267_s0 + $0x8] sm:$0xff]  ;;  %s128_s16 = sshll.u32 %s272_s5, 4  ;;  %s129_s16 = int_to_ptr.hbm [resolvable:$true] %s128_s16 }
   0x6   :  { %52 = vmatpush.msra.mxu0 %v24_v2  ;;  %146 = vmatpush.msra.mxu2 %v24_v2  ;;  %v21_v5 = vld [vmem:[%s267_s0] sm:$0xff]  ;;  %v65_v7 = vld [vmem:[%s270_s3 + $0x10] sm:$0xff]  ;;  %v64_v8 = vld [vmem:[%s270_s3 + $0x8] sm:$0xff]  ;;  %s192_s17 = smov 128   ;;  %s193_s18 = smov 8  }
   0x7   :  { %90 = vmatpush.msra.mxu1 %v65_v7  ;;  %149 = vmatpush.msra.mxu3 %v65_v7  ;;  %v63_v9 = vld [vmem:[%s270_s3] sm:$0xff] }
   0x8   :  { %53 = vmatpush.msra.mxu0 %v23_v4  ;;  %147 = vmatpush.msra.mxu2 %v23_v4  ;;  %v155_v10 = vld [vmem:[%s269_s2] ss:$0 sm:$0xff]  ;;  %s191_s2 = smov [#allocation2]  }
   0x9   :  { %140 = vmatmul.msk.f32.vlgmr.msra.gmra.mxu0 %vm31_vm0, %v21_v5  ;;  %141 = vmatmul.msk.f32.vlgmr.msra.gmra.mxu2 %vm31_vm0, %v22_v6  ;;  %v156_v17 = vld [vmem:[%s271_s4] ss:$0 sm:$0xff]  ;;  %s126_s3 = sshll.u32 %s191_s2, 4  ;;  %s127_s3 = int_to_ptr.vmem [resolvable:$true] %s126_s3 }
   0xa   :  { %91 = vmatpush.msra.mxu1 %v64_v8  ;;  %150 = vmatpush.msra.mxu3 %v64_v8 }
   0xc   :  { %92 = vmatpush.msra.mxu1 %v63_v9  ;;  %151 = vmatpush.msra.mxu3 %v63_v9 }
  0x86   :  { %v55_v11 = vpop.f32.mrf.mxu0 }
  0x87   :  { %v56_v12 = vadd.f32 %v155_v10, %v55_v11 }
  0x89   :  { %v61_v13 = vmax.f32 %v56_v12, 0.0 }
  0x8b   :  { %142 = vmatmul.msk.f32.vlgmr.msra.gmra.mxu1 %vm31_vm0, %v61_v13 }
  0x8c   :  { %v58_v14 = vpop.f32.mrf.mxu2 }
  0x8d   :  { %v59_v15 = vadd.f32 %v155_v10, %v58_v14 }
  0x8f   :  { %v62_v16 = vmax.f32 %v59_v15, 0.0 }
  0x91   :  { %143 = vmatmul.msk.f32.vlgmr.msra.gmra.mxu3 %vm31_vm0, %v62_v16 }
 0x108   :  { %v94_v18 = vpop.f32.mrf.mxu1 }
 0x109   :  { %v95_v19 = vadd.f32 %v156_v17, %v94_v18 }
 0x10b   :  { %100 = vmax.xlane.f32.xlu0 %v95_v19 }
 0x114   :  { %v97_v20 = vpop.f32.mrf.mxu3 }
 0x115   :  { %v98_v21 = vadd.f32 %v156_v17, %v97_v20 }
 0x117   :  { %102 = vmax.xlane.f32.xlu0 %v98_v21 }
 0x17e   :  { %v101_v22 = vpop.xlane.xlu0 %100 }
 0x17f   :  { %v104_v23 = vsub.f32 %v95_v19, %v101_v22 }
 0x181   :  { %v106_v24 = vmul.f32 1.442695, %v104_v23 }
 0x183   :  { %157 = vpow2.f32 %v106_v24 }
 0x189   :  { %v158_v25 = vpop.eup %157 }
 0x18a   :  { %110 = vadd.xlane.f32.xlu1 %v158_v25  ;;  %v103_v26 = vpop.xlane.xlu0 %102 }
 0x18b   :  { %v105_v27 = vsub.f32 %v98_v21, %v103_v26 }
 0x18d   :  { %v108_v28 = vmul.f32 1.442695, %v105_v27 }
 0x18f   :  { %159 = vpow2.f32 %v108_v28 }
 0x195   :  { %v160_v29 = vpop.eup %159 }
 0x196   :  { %112 = vadd.xlane.f32.xlu1 %v160_v29 }
 0x1fd   :  { %v111_v30 = vpop.xlane.xlu1 %110 }
 0x1fe   :  { %161 = vlog2.f32 %v111_v30 }
 0x204   :  { %v162_v31 = vpop.eup %161 }
 0x205   :  { %v115_v32 = vmul.f32 0.6931472, %v162_v31 }
 0x207   :  { %v118_v33 = vsub.f32 %v104_v23, %v115_v32 }
 0x209   :  { %120 = vst [vmem:[#allocation2] sm:$0xff] %v118_v33  ;;  %v113_v34 = vpop.xlane.xlu1 %112 }
 0x20a   :  { %163 = vlog2.f32 %v113_v34 }
 0x210   :  { %v164_v35 = vpop.eup %163 }
 0x211   :  { %v117_v36 = vmul.f32 0.6931472, %v164_v35 }
 0x213   :  { %v119_v37 = vsub.f32 %v105_v27, %v117_v36 }
 0x215   :  { %121 = vst [vmem:[#allocation2 + $0x8] sm:$0xff] %v119_v37 }
 0x216   :  { %134 = dma.vmem_to_hbm [thread:$0]  %s127_s3, 256, %s129_s16, [#allocation3], %s192_s17, %s192_s17, %s193_s18  }
 0x217   :  { %189 = dma.done.wait [#allocation3], 256  }
 0x218   :  { %190 = vsyncadd [#allocation3], 4294967040 }
 0x219   :  { %139 = vsyncpa [#allocation3], 1 }

</bundles_post_ra>
